<compile_context>
chip_gen: v7x
topology: tpu7x:2x2x1
jax: 0.10.0
libtpu: 0.0.40
codegen_flags: <defaults>
</compile_context>

<pallas_src>
import functools

import jax
import jax.numpy as jnp
from jax import lax
from jax.experimental import pallas as pl
from jax.experimental.pallas import tpu as pltpu


def _cont_infonce_kernel(zis_ref, ycand_ref, labels_ref, loss_ref, *,
                         n_rows, n_time, lag_chunk):
    """One anchor-row block: max-lag cross-correlation against all candidates,
    then this block's partial CrossEntropy(reduction='sum') contribution."""
    M, T = n_rows, n_time
    tm = zis_ref.shape[0]
    n_lags = 2 * T - 1

    # ---- anchor block: mean-center; fold unbiased std and 1/(T-1) into one
    # rsqrt(sum-of-squares) per-row scale (EUP rsqrt, no divide).  A zero-std
    # row is all-zero after centering, so the 0.0 replacement matches torch's
    # power_norm->1 behaviour (0/1 = 0).
    x = zis_ref[...].astype(jnp.float32)                        # (tm, T)
    x = x - jnp.mean(x, axis=1, keepdims=True)
    ssx = jnp.sum(x * x, axis=1, keepdims=True)
    x = x * jnp.where(ssx == 0.0, 0.0, lax.rsqrt(ssx))
    xb = x.astype(jnp.bfloat16)                                 # MXU operand dtype

    # Candidate slab: already centered / rsqrt-normalized / transposed /
    # zero-padded to (3T-2, M) bf16 in the wrapper; same block index every
    # grid step => DMA'd once and VMEM-resident.
    yslab = ycand_ref[...]                                      # (3T-2, M) bf16

    # ---- time-domain equivalent of the FFT circular correlation over 2T-pad:
    #   c[i, j, s] = sum_n x[i, n] * y[j, n - (s - (T-1))],  s in [0, 2T-2]
    # plus one exactly-zero circular slot -> running max initialized at 0.
    # Lags are batched into the matmul N dimension (lag_chunk lags per MXU
    # call); the lag shift walks the sublane dim of the transposed slab.
    best = jnp.zeros((tm, M), jnp.float32)
    dn = (((1,), (0,)), ((), ()))                               # (tm,T) x (T, L*M), MXU-native
    # TODO(synk): for production T (many lag chunks) move this static chunk
    # loop onto a lax.fori_loop / grid axis with a VMEM running-max accumulator.
    for s0 in range(0, n_lags, lag_chunk):
        lags = list(range(s0, min(s0 + lag_chunk, n_lags)))
        parts = [yslab[2 * T - 2 - s:3 * T - 2 - s, :] for s in lags]   # (T, M) each
        rhs = parts[0] if len(parts) == 1 else jnp.concatenate(parts, axis=1)
        cc = lax.dot_general(xb, rhs, dn, preferred_element_type=jnp.float32)
        for l in range(len(lags)):                              # (tm, M) lane slices
            best = jnp.maximum(best, cc[:, l * M:(l + 1) * M])

    dist = best                                                 # (tm, M) logits

    # ---- CrossEntropyLoss(reduction='sum') partial for this row block:
    #   sum_i [ logsumexp_j dist[i, j] - dist[i, speeds[i]] ]
    labels = labels_ref[...]                                    # (tm, 1) int32
    col = lax.broadcasted_iota(jnp.int32, (tm, M), 1)
    pos = jnp.sum(jnp.where(col == labels, dist, 0.0), axis=1, keepdims=True)
    row_max = jnp.max(dist, axis=1, keepdims=True)
    lse = row_max + jnp.log(jnp.sum(jnp.exp(dist - row_max), axis=1, keepdims=True))
    loss_ref[0, 0] = jnp.sum(lse - pos)


def cont_infonce_loss(zis, zjs, speeds):
    """Forward of Cont_InfoNCE.  (temperature / softmax exist on the PyTorch
    module but are unused by its forward, so they are omitted here.)"""
    zis = jnp.asarray(zis)
    zjs = jnp.asarray(zjs)
    assert zis.shape == zjs.shape and zis.ndim == 2
    M, T = zis.shape
    assert T >= 2

    # ---- candidate prep once, in plain XLA (normalize + transpose + pad), so
    # it is computed and DMA'd a single time and stays resident while anchor
    # row blocks stream.  Stored bf16 (MXU operand dtype, half the DMA bytes).
    y = zjs.astype(jnp.float32)
    y = y - jnp.mean(y, axis=1, keepdims=True)
    ssy = jnp.sum(y * y, axis=1, keepdims=True)
    y = y * jnp.where(ssy == 0.0, 0.0, lax.rsqrt(ssy))
    zpad = jnp.zeros((T - 1, M), jnp.float32)
    ycand = jnp.concatenate([zpad, y.T, zpad], axis=0).astype(jnp.bfloat16)  # (3T-2, M)

    labels = jnp.asarray(speeds, dtype=jnp.int32).reshape(M, 1)

    # anchor row-block size; ("parallel",) grid lets v7x use both TensorCores
    tm = M if M <= 256 else 256
    assert M % tm == 0, "row count must be a multiple of the row-block size"
    n_blocks = M // tm
    # batch enough lags per matmul to fill the MXU N dimension (~512 lanes)
    lag_chunk = max(1, min(2 * T - 1, pl.cdiv(512, M)))

    kernel = functools.partial(_cont_infonce_kernel, n_rows=M, n_time=T,
                               lag_chunk=lag_chunk)
    in_bytes = zis.dtype.itemsize
    partial = pl.pallas_call(
        kernel,
        grid=(n_blocks,),
        out_shape=jax.ShapeDtypeStruct((n_blocks, 1), jnp.float32),
        in_specs=[
            pl.BlockSpec((tm, T), lambda i: (i, 0)),             # anchor rows stream
            pl.BlockSpec((3 * T - 2, M), lambda i: (0, 0)),      # candidate slab, resident
            pl.BlockSpec((tm, 1), lambda i: (i, 0)),             # labels for this block
        ],
        out_specs=pl.BlockSpec((1, 1), lambda i: (i, 0), memory_space=pltpu.SMEM),
        compiler_params=pltpu.CompilerParams(
            dimension_semantics=("parallel",),
            vmem_limit_bytes=32 * 1024 * 1024),
        cost_estimate=pl.CostEstimate(
            flops=2 * M * M * T * (2 * T - 1) + 10 * M * M,
            transcendentals=M * M + 3 * M,
            bytes_accessed=M * T * in_bytes + (3 * T - 2) * M * 2 + M * 4 + n_blocks * 4),
    )(zis, ycand, labels)
    return jnp.sum(partial)


def _cont_infonce_ref(zis, zjs, speeds):
    """Pure-JAX reference mirroring the PyTorch module (FFT path)."""
    M, T = zis.shape

    def max_cross_corr(f1, f2):
        f1 = f1 - jnp.mean(f1, axis=-1, keepdims=True)
        f2 = f2 - jnp.mean(f2, axis=-1, keepdims=True)
        min_n = min(f1.shape[-1], f2.shape[-1])
        padded_n = max(f1.shape[-1], f2.shape[-1]) * 2
        f1p = jnp.pad(f1, ((0, 0), (0, padded_n - f1.shape[-1])))
        f2p = jnp.pad(f2, ((0, 0), (0, padded_n - f2.shape[-1])))
        xf = jnp.fft.rfft(f1p) * jnp.conj(jnp.fft.rfft(f2p))
        pn = (jnp.std(f1, axis=-1, keepdims=True, ddof=1)
              * jnp.std(f2, axis=-1, keepdims=True, ddof=1))
        pn = jnp.where(pn == 0, jnp.ones_like(pn), pn)
        cc = jnp.fft.irfft(xf / pn) / (min_n - 1)
        return jnp.max(cc, axis=-1)

    dist = jnp.stack([max_cross_corr(zis[i:i + 1], zjs) for i in range(M)])
    lse = jax.scipy.special.logsumexp(dist, axis=-1)
    pos = dist[jnp.arange(M), jnp.asarray(speeds)]
    return jnp.sum(lse - pos)


if __name__ == "__main__":
    M, T = 8, 8    # M augmentations x T time stamps
    key = jax.random.PRNGKey(0)
    k1, k2, k3 = jax.random.split(key, 3)
    zis = jax.random.normal(k1, (M, T), dtype=jnp.float32)
    zjs = jax.random.normal(k2, (M, T), dtype=jnp.float32)
    speeds = jax.random.randint(k3, (M,), 0, M, dtype=jnp.int32)

    loss = jax.block_until_ready(cont_infonce_loss(zis, zjs, speeds))
    ref = jax.block_until_ready(_cont_infonce_ref(zis, zjs, speeds))

    assert jnp.isfinite(loss), loss
    # bf16 MXU operands (f32 accumulation) => slightly looser tolerance than pure f32.
    assert jnp.allclose(loss, ref, rtol=5e-3, atol=5e-3), (loss, ref)
    print("KERNEL_OK")
</pallas_src>

<mosaic_0001>
module attributes {stable_mosaic.version = 11 : i64} {
  func.func @_cont_infonce_kernel(%arg0: i32, %arg1: memref<8x8xf32, #tpu.memory_space<vmem>>, %arg2: memref<22x8xbf16, #tpu.memory_space<vmem>>, %arg3: memref<8x1xi32, #tpu.memory_space<vmem>>, %arg4: memref<1x1xf32, #tpu.memory_space<smem>>) attributes {dimension_semantics = [#tpu.dimension_semantics<parallel>], iteration_bounds = array<i64: 1>, scalar_prefetch = 0 : i64, scratch_operands = 0 : i64, tpu.core_type = #tpu.core_type<tc>, window_params = [{transform_indices = @transform_0, window_bounds = array<i64: 8, 8>}, {pipeline_mode = #tpu.pipeline_mode<synchronous>, transform_indices = @transform_1, window_bounds = array<i64: 22, 8>}, {transform_indices = @transform_2, window_bounds = array<i64: 8, 1>}, {transform_indices = @transform_3, window_bounds = array<i64: 1, 1>}]} {
    %c0 = arith.constant 0 : index
    %c0_0 = arith.constant 0 : index
    %0 = vector.load %arg1[%c0, %c0_0] : memref<8x8xf32, #tpu.memory_space<vmem>>, vector<8x8xf32>
    %cst = arith.constant dense<0.000000e+00> : vector<8xf32>
    %1 = vector.multi_reduction <add>, %0, %cst [1] : vector<8x8xf32> to vector<8xf32>
    %2 = vector.shape_cast %1 : vector<8xf32> to vector<8x1xf32>
    %cst_1 = arith.constant 8.000000e+00 : f32
    %3 = vector.broadcast %cst_1 : f32 to vector<8x1xf32>
    %4 = arith.divf %2, %3 : vector<8x1xf32>
    %5 = vector.broadcast %4 : vector<8x1xf32> to vector<8x8xf32>
    %6 = arith.subf %0, %5 : vector<8x8xf32>
    %7 = arith.mulf %6, %6 : vector<8x8xf32>
    %cst_2 = arith.constant dense<0.000000e+00> : vector<8xf32>
    %8 = vector.multi_reduction <add>, %7, %cst_2 [1] : vector<8x8xf32> to vector<8xf32>
    %9 = vector.shape_cast %8 : vector<8xf32> to vector<8x1xf32>
    %cst_3 = arith.constant 0.000000e+00 : f32
    %10 = vector.broadcast %cst_3 : f32 to vector<8x1xf32>
    %11 = arith.cmpf oeq, %9, %10 : vector<8x1xf32>
    %12 = math.rsqrt %9 : vector<8x1xf32>
    %cst_4 = arith.constant 0.000000e+00 : f32
    %13 = vector.broadcast %cst_4 : f32 to vector<8x1xf32>
    %14 = arith.select %11, %13, %12 : vector<8x1xi1>, vector<8x1xf32>
    %15 = vector.broadcast %14 : vector<8x1xf32> to vector<8x8xf32>
    %16 = arith.mulf %6, %15 : vector<8x8xf32>
    %17 = arith.truncf %16 : vector<8x8xf32> to vector<8x8xbf16>
    %c0_5 = arith.constant 0 : index
    %c0_6 = arith.constant 0 : index
    %18 = vector.load %arg2[%c0_5, %c0_6] : memref<22x8xbf16, #tpu.memory_space<vmem>>, vector<22x8xbf16>
    %cst_7 = arith.constant 0.000000e+00 : f32
    %19 = vector.broadcast %cst_7 : f32 to vector<8x8xf32>
    %20 = vector.extract_strided_slice %18 {offsets = [14, 0], sizes = [8, 8], strides = [1, 1]} : vector<22x8xbf16> to vector<8x8xbf16>
    %21 = vector.extract_strided_slice %18 {offsets = [13, 0], sizes = [8, 8], strides = [1, 1]} : vector<22x8xbf16> to vector<8x8xbf16>
    %22 = vector.extract_strided_slice %18 {offsets = [12, 0], sizes = [8, 8], strides = [1, 1]} : vector<22x8xbf16> to vector<8x8xbf16>
    %23 = vector.extract_strided_slice %18 {offsets = [11, 0], sizes = [8, 8], strides = [1, 1]} : vector<22x8xbf16> to vector<8x8xbf16>
    %24 = vector.extract_strided_slice %18 {offsets = [10, 0], sizes = [8, 8], strides = [1, 1]} : vector<22x8xbf16> to vector<8x8xbf16>
    %25 = vector.extract_strided_slice %18 {offsets = [9, 0], sizes = [8, 8], strides = [1, 1]} : vector<22x8xbf16> to vector<8x8xbf16>
    %26 = vector.extract_strided_slice %18 {offsets = [8, 0], sizes = [8, 8], strides = [1, 1]} : vector<22x8xbf16> to vector<8x8xbf16>
    %27 = vector.extract_strided_slice %18 {offsets = [7, 0], sizes = [8, 8], strides = [1, 1]} : vector<22x8xbf16> to vector<8x8xbf16>
    %28 = vector.extract_strided_slice %18 {offsets = [6, 0], sizes = [8, 8], strides = [1, 1]} : vector<22x8xbf16> to vector<8x8xbf16>
    %29 = vector.extract_strided_slice %18 {offsets = [5, 0], sizes = [8, 8], strides = [1, 1]} : vector<22x8xbf16> to vector<8x8xbf16>
    %30 = vector.extract_strided_slice %18 {offsets = [4, 0], sizes = [8, 8], strides = [1, 1]} : vector<22x8xbf16> to vector<8x8xbf16>
    %31 = vector.extract_strided_slice %18 {offsets = [3, 0], sizes = [8, 8], strides = [1, 1]} : vector<22x8xbf16> to vector<8x8xbf16>
    %32 = vector.extract_strided_slice %18 {offsets = [2, 0], sizes = [8, 8], strides = [1, 1]} : vector<22x8xbf16> to vector<8x8xbf16>
    %33 = vector.extract_strided_slice %18 {offsets = [1, 0], sizes = [8, 8], strides = [1, 1]} : vector<22x8xbf16> to vector<8x8xbf16>
    %34 = vector.extract_strided_slice %18 {offsets = [0, 0], sizes = [8, 8], strides = [1, 1]} : vector<22x8xbf16> to vector<8x8xbf16>
    %35 = tpu.concatenate %20, %21, %22, %23, %24, %25, %26, %27, %28, %29, %30, %31, %32, %33, %34 in 1 : vector<8x8xbf16>, vector<8x8xbf16>, vector<8x8xbf16>, vector<8x8xbf16>, vector<8x8xbf16>, vector<8x8xbf16>, vector<8x8xbf16>, vector<8x8xbf16>, vector<8x8xbf16>, vector<8x8xbf16>, vector<8x8xbf16>, vector<8x8xbf16>, vector<8x8xbf16>, vector<8x8xbf16>, vector<8x8xbf16> -> vector<8x120xbf16>
    %cst_8 = arith.constant dense<0.000000e+00> : vector<8x120xf32>
    %36 = tpu.matmul %17, %35, %cst_8 {dimension_numbers = #tpu.dot_dimension_numbers<[1], [0], [0], [1], [0, 0, 1, 1], [], []>} : vector<8x8xbf16>, vector<8x120xbf16>, vector<8x120xf32> -> vector<8x120xf32>
    %37 = vector.extract_strided_slice %36 {offsets = [0, 0], sizes = [8, 8], strides = [1, 1]} : vector<8x120xf32> to vector<8x8xf32>
    %38 = arith.maximumf %19, %37 : vector<8x8xf32>
    %39 = vector.extract_strided_slice %36 {offsets = [0, 8], sizes = [8, 8], strides = [1, 1]} : vector<8x120xf32> to vector<8x8xf32>
    %40 = arith.maximumf %38, %39 : vector<8x8xf32>
    %41 = vector.extract_strided_slice %36 {offsets = [0, 16], sizes = [8, 8], strides = [1, 1]} : vector<8x120xf32> to vector<8x8xf32>
    %42 = arith.maximumf %40, %41 : vector<8x8xf32>
    %43 = vector.extract_strided_slice %36 {offsets = [0, 24], sizes = [8, 8], strides = [1, 1]} : vector<8x120xf32> to vector<8x8xf32>
    %44 = arith.maximumf %42, %43 : vector<8x8xf32>
    %45 = vector.extract_strided_slice %36 {offsets = [0, 32], sizes = [8, 8], strides = [1, 1]} : vector<8x120xf32> to vector<8x8xf32>
    %46 = arith.maximumf %44, %45 : vector<8x8xf32>
    %47 = vector.extract_strided_slice %36 {offsets = [0, 40], sizes = [8, 8], strides = [1, 1]} : vector<8x120xf32> to vector<8x8xf32>
    %48 = arith.maximumf %46, %47 : vector<8x8xf32>
    %49 = vector.extract_strided_slice %36 {offsets = [0, 48], sizes = [8, 8], strides = [1, 1]} : vector<8x120xf32> to vector<8x8xf32>
    %50 = arith.maximumf %48, %49 : vector<8x8xf32>
    %51 = vector.extract_strided_slice %36 {offsets = [0, 56], sizes = [8, 8], strides = [1, 1]} : vector<8x120xf32> to vector<8x8xf32>
    %52 = arith.maximumf %50, %51 : vector<8x8xf32>
    %53 = vector.extract_strided_slice %36 {offsets = [0, 64], sizes = [8, 8], strides = [1, 1]} : vector<8x120xf32> to vector<8x8xf32>
    %54 = arith.maximumf %52, %53 : vector<8x8xf32>
    %55 = vector.extract_strided_slice %36 {offsets = [0, 72], sizes = [8, 8], strides = [1, 1]} : vector<8x120xf32> to vector<8x8xf32>
    %56 = arith.maximumf %54, %55 : vector<8x8xf32>
    %57 = vector.extract_strided_slice %36 {offsets = [0, 80], sizes = [8, 8], strides = [1, 1]} : vector<8x120xf32> to vector<8x8xf32>
    %58 = arith.maximumf %56, %57 : vector<8x8xf32>
    %59 = vector.extract_strided_slice %36 {offsets = [0, 88], sizes = [8, 8], strides = [1, 1]} : vector<8x120xf32> to vector<8x8xf32>
    %60 = arith.maximumf %58, %59 : vector<8x8xf32>
    %61 = vector.extract_strided_slice %36 {offsets = [0, 96], sizes = [8, 8], strides = [1, 1]} : vector<8x120xf32> to vector<8x8xf32>
    %62 = arith.maximumf %60, %61 : vector<8x8xf32>
    %63 = vector.extract_strided_slice %36 {offsets = [0, 104], sizes = [8, 8], strides = [1, 1]} : vector<8x120xf32> to vector<8x8xf32>
    %64 = arith.maximumf %62, %63 : vector<8x8xf32>
    %65 = vector.extract_strided_slice %36 {offsets = [0, 112], sizes = [8, 8], strides = [1, 1]} : vector<8x120xf32> to vector<8x8xf32>
    %66 = arith.maximumf %64, %65 : vector<8x8xf32>
    %c0_9 = arith.constant 0 : index
    %c0_10 = arith.constant 0 : index
    %67 = vector.load %arg3[%c0_9, %c0_10] : memref<8x1xi32, #tpu.memory_space<vmem>>, vector<8x1xi32>
    %68 = tpu.iota {dimensions = array<i32: 1>} : vector<8x8xi32>
    %69 = vector.broadcast %67 : vector<8x1xi32> to vector<8x8xi32>
    %70 = arith.cmpi eq, %68, %69 : vector<8x8xi32>
    %cst_11 = arith.constant 0.000000e+00 : f32
    %71 = vector.broadcast %cst_11 : f32 to vector<8x8xf32>
    %72 = arith.select %70, %66, %71 : vector<8x8xi1>, vector<8x8xf32>
    %cst_12 = arith.constant dense<0.000000e+00> : vector<8xf32>
    %73 = vector.multi_reduction <add>, %72, %cst_12 [1] : vector<8x8xf32> to vector<8xf32>
    %74 = vector.shape_cast %73 : vector<8xf32> to vector<8x1xf32>
    %cst_13 = arith.constant dense<0xFF800000> : vector<8xf32>
    %75 = vector.multi_reduction <maximumf>, %66, %cst_13 [1] : vector<8x8xf32> to vector<8xf32>
    %76 = vector.shape_cast %75 : vector<8xf32> to vector<8x1xf32>
    %77 = vector.broadcast %76 : vector<8x1xf32> to vector<8x8xf32>
    %78 = arith.subf %66, %77 : vector<8x8xf32>
    %79 = math.exp %78 : vector<8x8xf32>
    %cst_14 = arith.constant dense<0.000000e+00> : vector<8xf32>
    %80 = vector.multi_reduction <add>, %79, %cst_14 [1] : vector<8x8xf32> to vector<8xf32>
    %81 = vector.shape_cast %80 : vector<8xf32> to vector<8x1xf32>
    %82 = math.log %81 : vector<8x1xf32>
    %83 = arith.addf %76, %82 : vector<8x1xf32>
    %84 = arith.subf %83, %74 : vector<8x1xf32>
    %85 = vector.shape_cast %84 : vector<8x1xf32> to vector<1x8x1xf32>
    %cst_15 = arith.constant dense<0.000000e+00> : vector<1xf32>
    %86 = vector.multi_reduction <add>, %85, %cst_15 [1, 2] : vector<1x8x1xf32> to vector<1xf32>
    %87 = vector.shape_cast %86 : vector<1xf32> to vector<1x1x1xf32>
    %88 = vector.extract %87[0, 0, 0] : f32 from vector<1x1x1xf32>
    %c0_16 = arith.constant 0 : index
    %c0_17 = arith.constant 0 : index
    %89 = memref.load %arg4[%c0_16, %c0_17] : memref<1x1xf32, #tpu.memory_space<smem>>
    memref.store %88, %arg4[%c0_16, %c0_17] : memref<1x1xf32, #tpu.memory_space<smem>>
    return
  }
  func.func @transform_0(%arg0: i32) -> (i32, i32) {
    %c0_i32 = arith.constant 0 : i32
    %c0_i32_0 = arith.constant 0 : i32
    return %arg0, %c0_i32 : i32, i32
  }
  func.func @transform_1(%arg0: i32) -> (i32, i32) {
    %c0_i32 = arith.constant 0 : i32
    %c0_i32_0 = arith.constant 0 : i32
    %c0_i32_1 = arith.constant 0 : i32
    return %c0_i32, %c0_i32_0 : i32, i32
  }
  func.func @transform_2(%arg0: i32) -> (i32, i32) {
    %c0_i32 = arith.constant 0 : i32
    %c0_i32_0 = arith.constant 0 : i32
    return %arg0, %c0_i32 : i32, i32
  }
  func.func @transform_3(%arg0: i32) -> (i32, i32) {
    %c0_i32 = arith.constant 0 : i32
    %c0_i32_0 = arith.constant 0 : i32
    return %arg0, %c0_i32 : i32, i32
  }
}

</mosaic_0001>

<bundles_post_ra>
// kernel: tpu_custom_call.1
= control target key start
LH: loop header
LB: loop body
LE: loop exit
PB: predicated region body
PF: predicated region fallthrough
CT: control target
= control target key end

     0   :  { %vm17_vm0 = vcmask 64512   ;;  %s473_s0 = inlined_call_operand.vmem [shape: f32[8,8], index: 0, kind: input, shape index: {}]   ;;  %s474_s1 = inlined_call_operand.vmem [shape: bf16[22,8], index: 1, kind: input, shape index: {}]   ;;  %s475_s2 = inlined_call_operand.vmem [shape: s32[8,1], index: 2, kind: input, shape index: {}]   ;;  %s476_s3 = inlined_call_operand.hbm [shape: f32[1,1], index: 3, kind: output, shape index: {}]  }
   0x1   :  { %v405_v0 = vld [vmem:[%s473_s0] sm:$0xff]  ;;  %v35_v2 = vld [vmem:[%s474_s1 + $0x8] sm:$0x7] }
   0x2   :  { %v34_v1 = vld [vmem:[%s474_s1 + $0x4] sm:$0xf]  ;;  %v18_v3 = vsel %vm17_vm0, %v405_v0, 0.0 }
   0x3   :  { %v415_v4 = vcombine.low %v34_v1, %v35_v2  ;;  %19 = vadd.xlane.f32.xlu0 %v18_v3 }
   0x4   :  { %8 = vsyncpa [#allocation3], 0  ;;  %s363_s0 = smov 16   ;;  %v33_v9 = vld [vmem:[%s474_s1] sm:$0xf]  ;;  %s364_s20 = smov 8   ;;  %v307_v16 = vcombine.low %v34_v1, %v34_v1 }
   0x5   :  { %v50_v5 = vrot.slane %v415_v4, 7  ;;  %v42_v6 = vshrl.u32 %v415_v4, 16  ;;  %v45_v7 = vshll.u32 %v415_v4, 16  ;;  %v308_v11 = vcombine.low %v33_v9, %v34_v1  ;;  %s365_s21 = smov 32   ;;  %s366_s22 = smov 40  }
   0x6   :  { %v58_v12 = vrot.slane %v415_v4, 6  ;;  %v67_v20 = vrot.slane %v307_v16, 5  ;;  %s367_s1 = smov 48   ;;  %s368_s23 = smov 24   ;;  %v309_v40 = vcombine.low %v33_v9, %v33_v9  ;;  %v376_v42 = vmov 0.0  }
   0x7   :  { %51 = vrot.lane.b32.xlu1 %v50_v5, %s363_s0  ;;  %v44_v8 = vrot.slane %v42_v6, 7  ;;  %v61_v13 = vrot.slane %v42_v6, 5  ;;  %v62_v14 = vrot.slane %v45_v7, 6  ;;  %v76_v17 = vshll.u32 %v308_v11, 16  ;;  %s369_s24 = smov 56   ;;  %s370_s25 = smov 80   ;;  %313 = vmatprep.subr.bf16.mxu0 %v376_v42 }
   0x8   :  { %v53_v18 = vrot.slane %v42_v6, 6  ;;  %v54_v19 = vrot.slane %v45_v7, 7  ;;  %v74_v21 = vshrl.u32 %v308_v11, 16  ;;  %v88_v25 = vrot.slane %v308_v11, 7  ;;  %s371_s26 = smov 64   ;;  %s372_s27 = smov 96  }
   0x9   :  { %v47_v10 = vor.u32 %v45_v7, %v44_v8  ;;  %v63_v15 = vor.u32 %v62_v14, %v61_v13  ;;  %v78_v22 = vrot.slane %v76_v17, 1  ;;  %v96_v27 = vrot.slane %v308_v11, 6  ;;  %s373_s28 = smov 72   ;;  %s374_s29 = smov 88  }
   0xa   :  { %v55_v23 = vor.u32 %v54_v19, %v53_v18  ;;  %v84_v26 = vrot.slane %v74_v21, 7  ;;  %v91_v29 = vrot.slane %v74_v21, 6  ;;  %v92_v30 = vrot.slane %v76_v17, 7  ;;  %s375_s30 = smov 104   ;;  %s377_s4 = smov 112   ;;  %v256_v19 = vld [vmem:[%s475_s2] sm:$0xff] }
   0xb   :  { %48 = vrot.lane.b32.xlu1 %v47_v10, %s364_s20  ;;  %v79_v24 = vor.u32 %v78_v22, %v74_v21  ;;  %v99_v32 = vrot.slane %v74_v21, 5  ;;  %v100_v33 = vrot.slane %v76_v17, 6  ;;  %v105_v41 = vrot.slane %v309_v40, 5  ;;  %s380_s5 = smov 120   ;;  %s351_s10 = scalar_lea.hbm %s476_s3, 16 }
   0xc   :  { %v85_v28 = vor.u32 %v84_v26, %v76_v17  ;;  %v93_v31 = vor.u32 %v92_v30, %v91_v29  ;;  %vm378_vm1 = vmmov 0   ;;  %vm110_vm2 = vcmask 130048   ;;  %p352_p0 = scmp.ne.s32.totalorder %s476_s3, %s351_s10  ;;  %p355_p1 = scmp.lt.u32.totalorder %s351_s10, %s476_s3 }
   0xd   :  { %v101_v34 = vor.u32 %v100_v33, %v99_v32  ;;  %315 = vmatprep.mubr.msk.bf16.mxu0 %vm378_vm1, %v376_v42  ;;  %vm113_vm3 = vcmask 195584   ;;  %vm116_vm4 = vcmask 261120   ;;  %vm119_vm5 = vcmask 326656  }
   0xe   :  { %vm122_vm6 = vcmask 392192   ;;  %vm125_vm7 = vcmask 457728   ;;  %vm128_vm8 = vcmask 523264   ;;  %vm131_vm9 = vcmask 588800   ;;  %p357_p2 = pnand %p355_p1, %p352_p0 }
   0xf   :  { %59 = vrot.lane.b32.xlu1 %v58_v12, %s365_s21  ;;  %vm134_vm10 = vcmask 654336   ;;  %vm137_vm11 = vcmask 719872   ;;  %vm140_vm12 = vcmask 785408   ;;  %vm143_vm13 = vcmask 850944  }
  0x10   :  { %vm146_vm14 = vcmask 916480   ;;  %vm154_vm15 = vcmask 1043456   ;;  %v379_v14 = vmov 0  }
  0x11   :  { %340 = vset.pattern.permute.xlu0 %v379_v14 }
  0x13   :  { %64 = vrot.lane.b32.xlu1 %v63_v15, %s366_s22 }
  0x17   :  { %68 = vrot.lane.b32.xlu1 %v67_v20, %s367_s1 }
  0x19   :  { %56 = vrot.lane.b32.xlu0 %v55_v23, %s368_s23 }
  0x1b   :  { %80 = vrot.lane.b32.xlu1 %v79_v24, %s369_s24 }
  0x1d   :  { %89 = vrot.lane.b32.xlu0 %v88_v25, %s370_s25 }
  0x1f   :  { %82 = vrot.lane.b32.xlu1 %v308_v11, %s371_s26 }
  0x21   :  { %97 = vrot.lane.b32.xlu0 %v96_v27, %s372_s27 }
  0x23   :  { %86 = vrot.lane.b32.xlu1 %v85_v28, %s373_s28 }
  0x27   :  { %94 = vrot.lane.b32.xlu1 %v93_v31, %s374_s29 }
  0x2b   :  { %102 = vrot.lane.b32.xlu1 %v101_v34, %s375_s30 }
  0x79   :  { %v52_v43 = vpop.permute.xlu1 %51 }
  0x7d   :  { %v49_v44 = vpop.permute.xlu1 %48 }
  0x7e   :  { %v109_v47 = vsel %vm17_vm0, %v415_v4, %v49_v44 }
  0x7f   :  { %v112_v49 = vsel %vm110_vm2, %v109_v47, %v52_v43 }
  0x81   :  { %v60_v45 = vpop.permute.xlu1 %59 }
  0x85   :  { %v65_v46 = vpop.permute.xlu1 %64 }
  0x89   :  { %v69_v48 = vpop.permute.xlu1 %68 }
  0x8d   :  { %v81_v52 = vpop.permute.xlu1 %80 }
  0x90   :  { %v20_v35 = vpop.xlane.xlu0 %19 }
  0x91   :  { %v22_v36 = vmul.f32 0.125, %v20_v35  ;;  %v83_v55 = vpop.permute.xlu1 %82 }
  0x93   :  { %v23_v37 = vsub.f32 %v405_v0, %v22_v36 }
  0x94   :  { %v57_v50 = vpop.permute.xlu0 %56 }
  0x95   :  { %v24_v38 = vmul.f32 %v23_v37, %v23_v37  ;;  %v115_v51 = vsel %vm113_vm3, %v112_v49, %v57_v50  ;;  %v87_v58 = vpop.permute.xlu1 %86  ;;  %v257_v50 = vlaneseq  ;;  %vm280_vm3 = vcmask 7168  }
  0x96   :  { %v118_v53 = vsel %vm116_vm4, %v115_v51, %v60_v45 }
  0x97   :  { %v25_v39 = vsel %vm17_vm0, %v24_v38, 0.0  ;;  %v121_v54 = vsel %vm119_vm5, %v118_v53, %v65_v46  ;;  %v258_v51 = vand.u32 127, %v257_v50 }
  0x98   :  { %26 = vadd.xlane.f32.xlu0 %v25_v39  ;;  %v124_v56 = vsel %vm122_vm6, %v121_v54, %v69_v48  ;;  %v90_v60 = vpop.permute.xlu0 %89 }
  0x99   :  { %v127_v57 = vsel %vm125_vm7, %v124_v56, %v81_v52  ;;  %v95_v63 = vpop.permute.xlu1 %94 }
  0x9a   :  { %v130_v59 = vsel %vm128_vm8, %v127_v57, %v83_v55 }
  0x9b   :  { %v133_v61 = vsel %vm131_vm9, %v130_v59, %v87_v58 }
  0x9c   :  { %v136_v62 = vsel %vm134_vm10, %v133_v61, %v90_v60  ;;  %v98_v0 = vpop.permute.xlu0 %97 }
  0x9d   :  { %v139_v1 = vsel %vm137_vm11, %v136_v62, %v95_v63  ;;  %v103_v4 = vpop.permute.xlu1 %102 }
  0x9e   :  { %v142_v3 = vsel %vm140_vm12, %v139_v1, %v98_v0 }
  0x9f   :  { %v145_v5 = vsel %vm143_vm13, %v142_v3, %v103_v4 }
  0xae   :  { %106 = vrot.lane.b32.xlu0 %v105_v41, %s377_s4 }
 0x125   :  { %v27_v2 = vpop.xlane.xlu0 %26 }
 0x126   :  { %345 = vrsqrt.f32 %v27_v2  ;;  %vm28_vm1 = vcmp.eq.f32.partialorder %v27_v2, 0.0 }
 0x129   :  { %v107_v6 = vpop.permute.xlu0 %106 }
 0x12a   :  { %v148_v7 = vsel %vm146_vm14, %v145_v5, %v107_v6 }
 0x12b   :  { %v150_v8 = vrot.slane %v148_v7, 3 }
 0x12d   :  { %v156_v9 = vsel %vm154_vm15, %v150_v8, 0 }
 0x12e   :  { %314 = vmatpush3.bf16.msra.mxu0 %v156_v9 }
 0x130   :  { %v346_v10 = vpop.eup %345 }
 0x131   :  { %v30_v11 = vsel %vm28_vm1, 0.0, %v346_v10 }
 0x132   :  { %v31_v12 = vmul.f32 %v30_v11, %v23_v37 }
 0x134   :  { %v32_v13 = vpack.c.bf16 %v31_v12, %v31_v12 }
 0x136   :  { %316 = vmatmul.mubr.msk.bf16.vlgmr.msra.gmra.mrb[0].mxu0 %vm17_vm0, %v32_v13 }
 0x209   :  { %v192_v15 = vpop.f32.mrb[0].mxu0 }
 0x20a   :  { %204 = vrot.lane.b32.xlu0 %v192_v15, %s377_s4  ;;  %200 = vrot.lane.b32.xlu1 %v192_v15, %s380_s5  ;;  %v317_v16 = vpop.f32.mrb[1].mxu0  ;;  %v198_v20 = vmax.f32 %v192_v15, 0.0 }
 0x20b   :  { %v195_v17 = vpop.f32.mrb[2].mxu0 }
 0x20c   :  { %v318_v18 = vpop.f32.mrb[3].mxu0 }
 0x20e   :  { %212 = vrot.lane.b32.xlu0 %v192_v15, %s372_s27  ;;  %208 = vrot.lane.b32.xlu1 %v192_v15, %s375_s30 }
 0x212   :  { %220 = vrot.lane.b32.xlu0 %v192_v15, %s370_s25  ;;  %216 = vrot.lane.b32.xlu1 %v192_v15, %s374_s29 }
 0x216   :  { %228 = vrot.lane.b32.xlu0 %v192_v15, %s371_s26  ;;  %224 = vrot.lane.b32.xlu1 %v192_v15, %s373_s28 }
 0x21a   :  { %236 = vrot.lane.b32.xlu0 %v192_v15, %s367_s1  ;;  %232 = vrot.lane.b32.xlu1 %v192_v15, %s369_s24 }
 0x21e   :  { %244 = vrot.lane.b32.xlu0 %v192_v15, %s365_s21  ;;  %240 = vrot.lane.b32.xlu1 %v192_v15, %s366_s22 }
 0x222   :  { %252 = vrot.lane.b32.xlu0 %v192_v15, %s363_s0  ;;  %248 = vrot.lane.b32.xlu1 %v192_v15, %s368_s23 }
 0x226   :  { %260 = vperm.xlu0 %340, %v256_v19  }
 0x27c   :  { %v205_v21 = vpop.permute.xlu0 %204  ;;  %v201_v22 = vpop.permute.xlu1 %200 }
 0x27d   :  { %v203_v23 = vmax.f32 %v198_v20, %v201_v22 }
 0x27f   :  { %v207_v24 = vmax.f32 %v203_v23, %v205_v21 }
 0x280   :  { %v213_v25 = vpop.permute.xlu0 %212  ;;  %v209_v26 = vpop.permute.xlu1 %208 }
 0x281   :  { %v211_v27 = vmax.f32 %v207_v24, %v209_v26 }
 0x283   :  { %v215_v28 = vmax.f32 %v211_v27, %v213_v25 }
 0x284   :  { %v221_v29 = vpop.permute.xlu0 %220  ;;  %v217_v30 = vpop.permute.xlu1 %216 }
 0x285   :  { %v219_v31 = vmax.f32 %v215_v28, %v217_v30 }
 0x287   :  { %v223_v32 = vmax.f32 %v219_v31, %v221_v29 }
 0x288   :  { %v229_v33 = vpop.permute.xlu0 %228  ;;  %v225_v34 = vpop.permute.xlu1 %224 }
 0x289   :  { %v227_v35 = vmax.f32 %v223_v32, %v225_v34 }
 0x28b   :  { %v231_v36 = vmax.f32 %v227_v35, %v229_v33 }
 0x28c   :  { %v237_v37 = vpop.permute.xlu0 %236  ;;  %v233_v38 = vpop.permute.xlu1 %232 }
 0x28d   :  { %v235_v39 = vmax.f32 %v231_v36, %v233_v38 }
 0x28f   :  { %v239_v40 = vmax.f32 %v235_v39, %v237_v37 }
 0x290   :  { %v245_v41 = vpop.permute.xlu0 %244  ;;  %v241_v42 = vpop.permute.xlu1 %240 }
 0x291   :  { %v243_v43 = vmax.f32 %v239_v40, %v241_v42 }
 0x293   :  { %v247_v44 = vmax.f32 %v243_v43, %v245_v41 }
 0x294   :  { %v249_v45 = vpop.permute.xlu1 %248  ;;  %v253_v47 = vpop.permute.xlu0 %252 }
 0x295   :  { %v251_v46 = vmax.f32 %v247_v44, %v249_v45 }
 0x297   :  { %v255_v48 = vmax.f32 %v251_v46, %v253_v47 }
 0x299   :  { %v267_v49 = vsel %vm17_vm0, %v255_v48, -inf }
 0x29a   :  { %268 = vmax.xlane.f32.xlu1 %v267_v49 }
 0x2a5   :  { %v261_v52 = vpop.permute.xlu0 %260 }
 0x2a6   :  { %vm262_vm2 = vcmp.eq.s32.totalorder %v258_v51, %v261_v52 }
 0x2a7   :  { %v263_v53 = vsel %vm262_vm2, %v255_v48, 0.0 }
 0x2a8   :  { %v264_v54 = vsel %vm17_vm0, %v263_v53, 0.0 }
 0x2a9   :  { %265 = vadd.xlane.f32.xlu1 %v264_v54 }
 0x327   :  { %v269_v55 = vpop.xlane.xlu1 %268 }
 0x328   :  { %v270_v56 = vsub.f32 %v255_v48, %v269_v55 }
 0x32a   :  { %v271_v57 = vmul.f32 1.442695, %v270_v56 }
 0x32c   :  { %347 = vpow2.f32 %v271_v57 }
 0x336   :  { %v348_v58 = vpop.eup %347  ;;  %v266_v0 = vpop.xlane.xlu1 %265 }
 0x337   :  { %v273_v59 = vsel %vm17_vm0, %v348_v58, 0.0 }
 0x338   :  { %274 = vadd.xlane.f32.xlu0 %v273_v59 }
 0x3c5   :  { %v275_v60 = vpop.xlane.xlu0 %274 }
 0x3c6   :  { %349 = vlog2.f32 %v275_v60 }
 0x3d0   :  { %v350_v61 = vpop.eup %349 }
 0x3d1   :  { %v277_v62 = vmul.f32 0.6931472, %v350_v61 }
 0x3d3   :  { %v278_v63 = vadd.f32 %v277_v62, %v269_v55 }
 0x3d5   :  { %v279_v1 = vsub.f32 %v278_v63, %v266_v0 }
 0x3d7   :  { %v281_v2 = vsel %vm280_vm3, %v279_v1, 0.0 }
 0x3d8   :  { %282 = vadd.xlane.f32.xlu1 %v281_v2 }
 0x465   :  { %v283_v3 = vpop.xlane.xlu1 %282 }
 0x466   :  { %v284_v4 = vrot.slane %v283_v3, 4 }
 0x468   :  { %v285_v5 = vadd.f32 %v284_v4, %v283_v3 }
 0x46a   :  { %v286_v6 = vrot.slane %v285_v5, 2 }
 0x46c   :  { %v287_v7 = vadd.f32 %v286_v6, %v285_v5 }
 0x46e   :  { %v288_v8 = vrot.slane %v287_v7, 1 }
 0x470   :  { %v289_v9 = vadd.f32 %v288_v8, %v287_v7 }
 0x472   :  { %319 = vpush %v289_v9 }
 0x4a3   :  { %s320_s2 = spop %319 }
 0x4a4   :  { %292 = sst [smem:[#allocation2]] %s320_s2 }
 0x4a5   :  { %360 = shalt.err (!%p357_p2)
}
 0x4a6   :  { %s381_s15 = smov [#allocation2]  }
 0x4a7   :  { %300 = dma.smem_to_hbm %s381_s15, 16, %s476_s3, [#allocation3]  }
 0x4a8   :  { %361 = dma.done.wait [#allocation3], 16  }
 0x4a9   :  { %362 = vsyncadd [#allocation3], 4294967280 }
 0x4aa   :  { %304 = sfence }
 0x4ab   :  { %305 = vsyncpa [#allocation3], 1 }

</bundles_post_ra>
